<compile_context>
chip_gen: v6e
topology: v6e:2x2x1
jax: 0.10.0
libtpu: 0.0.40
codegen_flags: <defaults>
</compile_context>

<pallas_src>
import jax
import jax.numpy as jnp
from jax.experimental import pallas as pl
from jax.experimental.pallas import tpu as pltpu

INPUT_DIM = 2 * 20 * 10   # 400 (multiple of 8 -> legal sublane-aligned full-dim block)
HIDDEN1 = 128
HIDDEN2 = 64
OUTPUT_DIM = 6
OUTPUT_PAD = 8            # narrow f32 output (lanes 0..5 real, 6..7 zero)

DEFAULT_BLOCK_B = 2048    # large batch tile: amortizes per-grid-step overhead


def _cdiv(a, b):
    return -(-a // b)


def _round_up(n, m):
    return ((n + m - 1) // m) * m


def _pick_bt(B, block_b):
    """Pick a batch tile that bounds padding waste and gives >=2 grid steps on v7x
    (2 TensorCores) once there is enough work; tiles rounded to 16 (bf16 packing)."""
    min_tiles = 2 if B >= 256 else 1
    n_tiles = max(min_tiles, _cdiv(B, block_b))
    return _round_up(max(_cdiv(B, n_tiles), 1), 16)


def dqn_kernel(x_ref, w1_ref, b1_ref, w2_ref, b2_ref, w3_ref, b3_ref, o_ref):
    # x arrives as f32 straight from HBM; cast to bf16 in-register for the MXU.
    x = x_ref[...].astype(jnp.bfloat16)
    # Layer 1: Linear(400 -> 128) + ReLU. bf16 operands, f32 MXU accumulate.
    h1 = jnp.dot(x, w1_ref[...], preferred_element_type=jnp.float32)
    h1 = jnp.maximum(h1 + b1_ref[...], 0.0)
    # Layer 2: Linear(128 -> 64) + ReLU.
    h2 = jnp.dot(h1.astype(jnp.bfloat16), w2_ref[...], preferred_element_type=jnp.float32)
    h2 = jnp.maximum(h2 + b2_ref[...], 0.0)
    # Layer 3: Linear(64 -> 8pad), no activation; narrow f32 store (lanes 6..7 are zero).
    out = jnp.dot(h2.astype(jnp.bfloat16), w3_ref[...], preferred_element_type=jnp.float32)
    o_ref[...] = (out + b3_ref[...]).astype(o_ref.dtype)


def prepare_params(params):
    """Cast matmul weights to bf16; zero-pad only the tiny output dim (6 -> 8)."""
    w1, b1, w2, b2, w3, b3 = params
    w1p = w1.astype(jnp.bfloat16)                                   # (400, 128)
    b1p = b1.reshape(1, HIDDEN1).astype(jnp.float32)                # (1, 128)
    w2p = w2.astype(jnp.bfloat16)                                   # (128, 64)
    b2p = b2.reshape(1, HIDDEN2).astype(jnp.float32)                # (1, 64)
    w3p = (jnp.zeros((HIDDEN2, OUTPUT_PAD), jnp.float32)
           .at[:, :OUTPUT_DIM].set(w3)).astype(jnp.bfloat16)        # (64, 8)
    b3p = (jnp.zeros((1, OUTPUT_PAD), jnp.float32)
           .at[:, :OUTPUT_DIM].set(b3.reshape(1, OUTPUT_DIM)))      # (1, 8)
    return (w1p, b1p, w2p, b2p, w3p, b3p)


def dqn_forward(x, padded_params, block_b=DEFAULT_BLOCK_B):
    w1p, b1p, w2p, b2p, w3p, b3p = padded_params
    B = x.shape[0]

    bt = _pick_bt(B, block_b)
    B_pad = _round_up(B, bt)
    # Batch padding only when needed (no feature-dim pad / dtype cast pass over x anymore).
    xp = x if B_pad == B else jnp.pad(x, ((0, B_pad - B), (0, 0)))

    const2d = lambda i: (0, 0)  # weights/biases: same block every step -> VMEM-resident
    out = pl.pallas_call(
        dqn_kernel,
        out_shape=jax.ShapeDtypeStruct((B_pad, OUTPUT_PAD), jnp.float32),
        grid=(B_pad // bt,),
        in_specs=[
            pl.BlockSpec((bt, INPUT_DIM), lambda i: (i, 0)),   # x tile, double-buffered
            pl.BlockSpec((INPUT_DIM, HIDDEN1), const2d),
            pl.BlockSpec((1, HIDDEN1), const2d),
            pl.BlockSpec((HIDDEN1, HIDDEN2), const2d),
            pl.BlockSpec((1, HIDDEN2), const2d),
            pl.BlockSpec((HIDDEN2, OUTPUT_PAD), const2d),
            pl.BlockSpec((1, OUTPUT_PAD), const2d),
        ],
        out_specs=pl.BlockSpec((bt, OUTPUT_PAD), lambda i: (i, 0)),
        compiler_params=pltpu.CompilerParams(
            # Batch tiles are independent -> shards across both TCs on v7x.
            dimension_semantics=("parallel",),
            # ~15 MiB actual footprint at bt=2048; 32 MiB is safe on v5e/v6e/v7x.
            vmem_limit_bytes=32 * 1024 * 1024,
        ),
    )(xp, w1p, b1p, w2p, b2p, w3p, b3p)

    # Slice away batch padding and the 2 zero output lanes (tiny: 32 B/row).
    return out[:B, :OUTPUT_DIM]


def init_params(key):
    # Deterministic init mimicking nn.Linear default (uniform(+-1/sqrt(fan_in))).
    def linear(key, fan_in, fan_out):
        kw, kb = jax.random.split(key)
        bound = 1.0 / jnp.sqrt(fan_in)
        w = jax.random.uniform(kw, (fan_in, fan_out), jnp.float32, -bound, bound)
        b = jax.random.uniform(kb, (1, fan_out), jnp.float32, -bound, bound)
        return w, b

    k1, k2, k3 = jax.random.split(key, 3)
    w1, b1 = linear(k1, INPUT_DIM, HIDDEN1)
    w2, b2 = linear(k2, HIDDEN1, HIDDEN2)
    w3, b3 = linear(k3, HIDDEN2, OUTPUT_DIM)
    return (w1, b1, w2, b2, w3, b3)


def reference_forward(x, params):
    w1, b1, w2, b2, w3, b3 = params
    h1 = jnp.maximum(x @ w1 + b1, 0.0)
    h2 = jnp.maximum(h1 @ w2 + b2, 0.0)
    return h2 @ w3 + b3


if __name__ == "__main__":
    key = jax.random.PRNGKey(0)
    kx, kp = jax.random.split(key)
    B = 8
    x = jax.random.normal(kx, (B, INPUT_DIM), jnp.float32)
    params = init_params(kp)
    padded = prepare_params(params)

    out = dqn_forward(x, padded)
    out = jax.block_until_ready(out)

    ref = reference_forward(x, params)
    assert out.shape == (B, OUTPUT_DIM)
    # bf16 matmul operands with f32 accumulation -> bf16-appropriate tolerance.
    assert jnp.allclose(out, ref, atol=5e-2, rtol=5e-2), float(jnp.max(jnp.abs(out - ref)))
    print("KERNEL_OK")
</pallas_src>

<mosaic_0001>
module attributes {stable_mosaic.version = 11 : i64} {
  func.func @dqn_kernel(%arg0: i32, %arg1: memref<16x400xf32, #tpu.memory_space<vmem>>, %arg2: memref<400x128xbf16, #tpu.memory_space<vmem>>, %arg3: memref<1x128xf32, #tpu.memory_space<vmem>>, %arg4: memref<128x64xbf16, #tpu.memory_space<vmem>>, %arg5: memref<1x64xf32, #tpu.memory_space<vmem>>, %arg6: memref<64x8xbf16, #tpu.memory_space<vmem>>, %arg7: memref<1x8xf32, #tpu.memory_space<vmem>>, %arg8: memref<16x8xf32, #tpu.memory_space<vmem>>) attributes {dimension_semantics = [#tpu.dimension_semantics<parallel>], iteration_bounds = array<i64: 1>, scalar_prefetch = 0 : i64, scratch_operands = 0 : i64, tpu.core_type = #tpu.core_type<tc>, window_params = [{transform_indices = @transform_0, window_bounds = array<i64: 16, 400>}, {pipeline_mode = #tpu.pipeline_mode<synchronous>, transform_indices = @transform_1, window_bounds = array<i64: 400, 128>}, {pipeline_mode = #tpu.pipeline_mode<synchronous>, transform_indices = @transform_2, window_bounds = array<i64: 1, 128>}, {pipeline_mode = #tpu.pipeline_mode<synchronous>, transform_indices = @transform_3, window_bounds = array<i64: 128, 64>}, {pipeline_mode = #tpu.pipeline_mode<synchronous>, transform_indices = @transform_4, window_bounds = array<i64: 1, 64>}, {pipeline_mode = #tpu.pipeline_mode<synchronous>, transform_indices = @transform_5, window_bounds = array<i64: 64, 8>}, {pipeline_mode = #tpu.pipeline_mode<synchronous>, transform_indices = @transform_6, window_bounds = array<i64: 1, 8>}, {transform_indices = @transform_7, window_bounds = array<i64: 16, 8>}]} {
    %c0 = arith.constant 0 : index
    %c0_0 = arith.constant 0 : index
    %0 = vector.load %arg1[%c0, %c0_0] : memref<16x400xf32, #tpu.memory_space<vmem>>, vector<16x400xf32>
    %1 = arith.truncf %0 : vector<16x400xf32> to vector<16x400xbf16>
    %c0_1 = arith.constant 0 : index
    %c0_2 = arith.constant 0 : index
    %2 = vector.load %arg2[%c0_1, %c0_2] : memref<400x128xbf16, #tpu.memory_space<vmem>>, vector<400x128xbf16>
    %cst = arith.constant dense<0.000000e+00> : vector<16x128xf32>
    %3 = tpu.matmul %1, %2, %cst {dimension_numbers = #tpu.dot_dimension_numbers<[1], [0], [0], [1], [0, 0, 1, 1], [], []>} : vector<16x400xbf16>, vector<400x128xbf16>, vector<16x128xf32> -> vector<16x128xf32>
    %c0_3 = arith.constant 0 : index
    %c0_4 = arith.constant 0 : index
    %4 = vector.load %arg3[%c0_3, %c0_4] : memref<1x128xf32, #tpu.memory_space<vmem>>, vector<1x128xf32>
    %5 = vector.broadcast %4 : vector<1x128xf32> to vector<16x128xf32>
    %6 = arith.addf %3, %5 : vector<16x128xf32>
    %cst_5 = arith.constant 0.000000e+00 : f32
    %7 = vector.broadcast %cst_5 : f32 to vector<16x128xf32>
    %8 = arith.maximumf %6, %7 : vector<16x128xf32>
    %9 = arith.truncf %8 : vector<16x128xf32> to vector<16x128xbf16>
    %c0_6 = arith.constant 0 : index
    %c0_7 = arith.constant 0 : index
    %10 = vector.load %arg4[%c0_6, %c0_7] : memref<128x64xbf16, #tpu.memory_space<vmem>>, vector<128x64xbf16>
    %cst_8 = arith.constant dense<0.000000e+00> : vector<16x64xf32>
    %11 = tpu.matmul %9, %10, %cst_8 {dimension_numbers = #tpu.dot_dimension_numbers<[1], [0], [0], [1], [0, 0, 1, 1], [], []>} : vector<16x128xbf16>, vector<128x64xbf16>, vector<16x64xf32> -> vector<16x64xf32>
    %c0_9 = arith.constant 0 : index
    %c0_10 = arith.constant 0 : index
    %12 = vector.load %arg5[%c0_9, %c0_10] : memref<1x64xf32, #tpu.memory_space<vmem>>, vector<1x64xf32>
    %13 = vector.broadcast %12 : vector<1x64xf32> to vector<16x64xf32>
    %14 = arith.addf %11, %13 : vector<16x64xf32>
    %cst_11 = arith.constant 0.000000e+00 : f32
    %15 = vector.broadcast %cst_11 : f32 to vector<16x64xf32>
    %16 = arith.maximumf %14, %15 : vector<16x64xf32>
    %17 = arith.truncf %16 : vector<16x64xf32> to vector<16x64xbf16>
    %c0_12 = arith.constant 0 : index
    %c0_13 = arith.constant 0 : index
    %18 = vector.load %arg6[%c0_12, %c0_13] : memref<64x8xbf16, #tpu.memory_space<vmem>>, vector<64x8xbf16>
    %cst_14 = arith.constant dense<0.000000e+00> : vector<16x8xf32>
    %19 = tpu.matmul %17, %18, %cst_14 {dimension_numbers = #tpu.dot_dimension_numbers<[1], [0], [0], [1], [0, 0, 1, 1], [], []>} : vector<16x64xbf16>, vector<64x8xbf16>, vector<16x8xf32> -> vector<16x8xf32>
    %c0_15 = arith.constant 0 : index
    %c0_16 = arith.constant 0 : index
    %20 = vector.load %arg7[%c0_15, %c0_16] : memref<1x8xf32, #tpu.memory_space<vmem>>, vector<1x8xf32>
    %21 = vector.broadcast %20 : vector<1x8xf32> to vector<16x8xf32>
    %22 = arith.addf %19, %21 : vector<16x8xf32>
    %c0_17 = arith.constant 0 : index
    %c0_18 = arith.constant 0 : index
    %23 = vector.load %arg8[%c0_17, %c0_18] : memref<16x8xf32, #tpu.memory_space<vmem>>, vector<16x8xf32>
    tpu.vector_store %arg8[%c0_17, %c0_18], %22 {strides = array<i32>} : memref<16x8xf32, #tpu.memory_space<vmem>>, vector<16x8xf32>,
    return
  }
  func.func @transform_0(%arg0: i32) -> (i32, i32) {
    %c0_i32 = arith.constant 0 : i32
    %c0_i32_0 = arith.constant 0 : i32
    return %arg0, %c0_i32 : i32, i32
  }
  func.func @transform_1(%arg0: i32) -> (i32, i32) {
    %c0_i32 = arith.constant 0 : i32
    %c0_i32_0 = arith.constant 0 : i32
    %c0_i32_1 = arith.constant 0 : i32
    return %c0_i32, %c0_i32_0 : i32, i32
  }
  func.func @transform_2(%arg0: i32) -> (i32, i32) {
    %c0_i32 = arith.constant 0 : i32
    %c0_i32_0 = arith.constant 0 : i32
    %c0_i32_1 = arith.constant 0 : i32
    return %c0_i32, %c0_i32_0 : i32, i32
  }
  func.func @transform_3(%arg0: i32) -> (i32, i32) {
    %c0_i32 = arith.constant 0 : i32
    %c0_i32_0 = arith.constant 0 : i32
    %c0_i32_1 = arith.constant 0 : i32
    return %c0_i32, %c0_i32_0 : i32, i32
  }
  func.func @transform_4(%arg0: i32) -> (i32, i32) {
    %c0_i32 = arith.constant 0 : i32
    %c0_i32_0 = arith.constant 0 : i32
    %c0_i32_1 = arith.constant 0 : i32
    return %c0_i32, %c0_i32_0 : i32, i32
  }
  func.func @transform_5(%arg0: i32) -> (i32, i32) {
    %c0_i32 = arith.constant 0 : i32
    %c0_i32_0 = arith.constant 0 : i32
    %c0_i32_1 = arith.constant 0 : i32
    return %c0_i32, %c0_i32_0 : i32, i32
  }
  func.func @transform_6(%arg0: i32) -> (i32, i32) {
    %c0_i32 = arith.constant 0 : i32
    %c0_i32_0 = arith.constant 0 : i32
    %c0_i32_1 = arith.constant 0 : i32
    return %c0_i32, %c0_i32_0 : i32, i32
  }
  func.func @transform_7(%arg0: i32) -> (i32, i32) {
    %c0_i32 = arith.constant 0 : i32
    %c0_i32_0 = arith.constant 0 : i32
    return %arg0, %c0_i32 : i32, i32
  }
}

</mosaic_0001>

<bundles_post_ra>
// kernel: tpu_custom_call.1
= control target key start
LH: loop header
LB: loop body
LE: loop exit
PB: predicated region body
PF: predicated region fallthrough
CT: control target
= control target key end

     0   :  { %12 = vsyncpa [#allocation3], 0  ;;  %s731_s24 = smov [#allocation2]   ;;  %s864_s0 = inlined_call_operand.vmem [shape: f32[16,400], index: 0, kind: input, shape index: {}]   ;;  %s865_s1 = inlined_call_operand.hbm [shape: bf16[400,128], index: 1, kind: input, shape index: {}]   ;;  %s866_s2 = inlined_call_operand.vmem [shape: f32[1,128], index: 2, kind: input, shape index: {}]   ;;  %s867_s3 = inlined_call_operand.vmem [shape: bf16[128,64], index: 3, kind: input, shape index: {}]   ;;  %s868_s4 = inlined_call_operand.vmem [shape: f32[1,64], index: 4, kind: input, shape index: {}]   ;;  %s869_s5 = inlined_call_operand.vmem [shape: bf16[64,8], index: 5, kind: input, shape index: {}]   ;;  %s870_s6 = inlined_call_operand.vmem [shape: f32[1,8], index: 6, kind: input, shape index: {}]   ;;  %s871_s7 = inlined_call_operand.vmem [shape: f32[16,8], index: 7, kind: output, shape index: {}]  }
   0x1   :  { %s20_s25 = sshll.u32 %s731_s24, 4  ;;  %s21_s25 = int_to_ptr.vmem [resolvable:$true] %s20_s25 }
   0x2   :  { %s717_s26 = scalar_lea.vmem %s21_s25, 3200  ;;  %p722_p1 = scmp.lt.s32.totalorder %s21_s25, %s21_s25 }
   0x3   :  { %p718_p0 = scmp.ne.s32.totalorder %s21_s25, %s717_s26  ;;  %p723_p2 = scmp.lt.s32.totalorder %s717_s26, %s717_s26 }
   0x5   :  { %p724_p3 = por %p723_p2, %p722_p1 }
   0x7   :  { %p725_p4 = pnand %p724_p3, %p718_p0 }
   0x9   :  { %728 = shalt.err (!%p725_p4)
}
   0xa   :  { %s732_s27 = smov 64   ;;  %s733_s28 = smov 4  }
   0xb   :  { %26 = dma.hbm_to_vmem [thread:$0]  %s865_s1, 3200, %s21_s25, [#allocation3], %s732_s27, %s732_s27, %s733_s28  }
   0xc   :  { %729 = dma.done.wait [#allocation3], 3200  }
   0xd   :  { %730 = vsyncadd [#allocation3], 4294964096  ;;  %v734_v0 = vmov 0   ;;  %v672_v1 = vld [vmem:[#allocation2 + $0x78] sm:$0xff]   ;;  %v675_v4 = vld [vmem:[#allocation2 + $0x70] sm:$0xff]   ;;  %vm260_vm0 = vcmask 130048  }
   0xe   :  { %305 = vmatprep.subr.bf16.mxu1 %v734_v0  ;;  %v673_v2 = vld [vmem:[#allocation2 + $0xb8] sm:$0xff]   ;;  %598 = vmatprep.subr.bf16.mxu0 %v672_v1  ;;  %v676_v5 = vld [vmem:[#allocation2 + $0xb0] sm:$0xff]   ;;  %v678_v7 = vld [vmem:[#allocation2 + $0x68] sm:$0xff]   ;;  %v735_v38 = vmov 0.0   ;;  %vm736_vm1 = vmmov 0   ;;  %vm503_vm2 = vcmask 523264  }
   0xf   :  { %v674_v3 = vld [vmem:[#allocation2 + $0x38] sm:$0xff]   ;;  %306 = vmatpush1.bf16.msra.mxu1 %v673_v2  ;;  %v677_v6 = vld [vmem:[#allocation2 + $0x30] sm:$0xff]   ;;  %v679_v8 = vld [vmem:[#allocation2 + $0xa8] sm:$0xff]   ;;  %vm548_vm3 = vcmask 64512  }
  0x10   :  { %599 = vmatpush3.bf16.msra.mxu0 %v674_v3  ;;  %307 = vmatprep.subr.bf16.mxu1 %v734_v0  ;;  %v680_v9 = vld [vmem:[#allocation2 + $0x28] sm:$0xff]   ;;  %v681_v10 = vld [vmem:[#allocation2 + $0x60] sm:$0xff]   ;;  %v684_v13 = vld [vmem:[#allocation2 + $0x58] sm:$0xff]  }
  0x11   :  { %600 = vmatprep.subr.bf16.mxu0 %v675_v4  ;;  %v682_v11 = vld [vmem:[#allocation2 + $0xa0] sm:$0xff]   ;;  %v685_v14 = vld [vmem:[#allocation2 + $0x98] sm:$0xff]   ;;  %v687_v16 = vld [vmem:[#allocation2 + $0x50] sm:$0xff]  }
  0x12   :  { %v683_v12 = vld [vmem:[#allocation2 + $0x20] sm:$0xff]   ;;  %v686_v15 = vld [vmem:[#allocation2 + $0x18] sm:$0xff]   ;;  %v688_v17 = vld [vmem:[#allocation2 + $0x90] sm:$0xff]  }
  0x13   :  { %308 = vmatpush1.bf16.msra.mxu1 %v676_v5  ;;  %v689_v18 = vld [vmem:[#allocation2 + $0x10] sm:$0xff]   ;;  %v690_v19 = vld [vmem:[#allocation2 + $0x48] sm:$0xff]   ;;  %v693_v24 = vld [vmem:[#allocation2 + $0x40] sm:$0xff]  }
  0x14   :  { %601 = vmatpush3.bf16.msra.mxu0 %v677_v6  ;;  %309 = vmatprep.subr.bf16.mxu1 %v734_v0  ;;  %v691_v20 = vld [vmem:[#allocation2 + $0x88] sm:$0xff]   ;;  %v694_v26 = vld [vmem:[#allocation2 + $0x80] sm:$0xff]   ;;  %v44_v27 = vld [vmem:[%s864_s0 + $0x18] sm:$0xff] }
  0x15   :  { %602 = vmatprep.subr.bf16.mxu0 %v678_v7  ;;  %v692_v21 = vld [vmem:[#allocation2 + $0x8] sm:$0xff]   ;;  %v48_v28 = vld [vmem:[%s864_s0 + $0x38] sm:$0xff]  ;;  %v695_v29 = vld [vmem:[#allocation2] sm:$0xff]  }
  0x16   :  { %v42_v22 = vld [vmem:[%s864_s0 + $0x8] sm:$0xff]  ;;  %v41_v30 = vld [vmem:[%s864_s0] sm:$0xff]  ;;  %v52_v31 = vpack.c.bf16 %v48_v28, %v44_v27  ;;  %v43_v34 = vld [vmem:[%s864_s0 + $0x10] sm:$0xff] }
  0x17   :  { %310 = vmatpush1.bf16.msra.mxu1 %v679_v8  ;;  %v46_v23 = vld [vmem:[%s864_s0 + $0x28] sm:$0xff]  ;;  %v45_v32 = vld [vmem:[%s864_s0 + $0x20] sm:$0xff]  ;;  %v47_v35 = vld [vmem:[%s864_s0 + $0x30] sm:$0xff] }
  0x18   :  { %603 = vmatpush3.bf16.msra.mxu0 %v680_v9  ;;  %311 = vmatprep.subr.bf16.mxu1 %v734_v0  ;;  %v50_v25 = vpack.c.bf16 %v46_v23, %v42_v22  ;;  %v696_v33 = vld [vmem:[#allocation2 + $0xc0] sm:$0xff]   ;;  %v49_v36 = vpack.c.bf16 %v45_v32, %v41_v30  ;;  %v697_v37 = vld [vmem:[%s867_s3 + $0x38] sm:$0xff]   ;;  %v51_v39 = vpack.c.bf16 %v47_v35, %v43_v34  ;;  %v698_v40 = vld [vmem:[%s867_s3 + $0x30] sm:$0xff]  }
  0x19   :  { %604 = vmatprep.subr.bf16.mxu0 %v681_v10  ;;  %582 = vmatprep.mubr.msk.bf16.mxu1 %vm260_vm0, %v52_v31  ;;  %v699_v41 = vld [vmem:[%s867_s3 + $0x28] sm:$0xff]   ;;  %v700_v42 = vld [vmem:[%s867_s3 + $0x20] sm:$0xff]   ;;  %v701_v43 = vld [vmem:[%s867_s3 + $0x18] sm:$0xff]  }
  0x1a   :  { %296 = vmatprep.mubr.bf16.mxu0 %v50_v25  ;;  %v702_v44 = vld [vmem:[%s867_s3 + $0x10] sm:$0xff]   ;;  %v703_v45 = vld [vmem:[%s867_s3 + $0x8] sm:$0xff]   ;;  %v704_v46 = vld [vmem:[%s867_s3] sm:$0xff]  }
  0x1b   :  { %312 = vmatpush1.bf16.msra.mxu1 %v682_v11  ;;  %v705_v47 = vld [vmem:[%s869_s5 + $0x18] sm:$0xff]   ;;  %v556_v50 = vld [vmem:[%s866_s2] ss:$0 sm:$0xff]  ;;  %v706_v2 = vld [vmem:[%s869_s5 + $0x10] sm:$0xff]  }
  0x1c   :  { %605 = vmatpush3.bf16.msra.mxu0 %v683_v12  ;;  %313 = vmatprep.subr.bf16.mxu1 %v734_v0  ;;  %v707_v3 = vld [vmem:[%s869_s5 + $0x8] sm:$0xff]   ;;  %v708_v4 = vld [vmem:[%s869_s5] sm:$0xff]  }
  0x1d   :  { %606 = vmatprep.subr.bf16.mxu0 %v684_v13  ;;  %v583_v5 = vld [vmem:[%s868_s4] ss:$0 sm:$0xff] }
  0x1f   :  { %314 = vmatpush1.bf16.msra.mxu1 %v685_v14 }
  0x20   :  { %607 = vmatpush3.bf16.msra.mxu0 %v686_v15  ;;  %315 = vmatprep.subr.bf16.mxu1 %v734_v0  ;;  %v592_v15 = vld [vmem:[%s870_s6] ss:$0 sm:$0xff] }
  0x21   :  { %608 = vmatprep.subr.bf16.mxu0 %v687_v16 }
  0x23   :  { %316 = vmatpush1.bf16.msra.mxu1 %v688_v17 }
  0x24   :  { %609 = vmatpush3.bf16.msra.mxu0 %v689_v18  ;;  %317 = vmatprep.subr.bf16.mxu1 %v734_v0 }
  0x25   :  { %610 = vmatprep.subr.bf16.mxu0 %v690_v19 }
  0x27   :  { %318 = vmatpush1.bf16.msra.mxu1 %v691_v20 }
  0x28   :  { %611 = vmatpush3.bf16.msra.mxu0 %v692_v21  ;;  %319 = vmatprep.subr.bf16.mxu1 %v734_v0 }
  0x29   :  { %612 = vmatprep.subr.bf16.mxu0 %v693_v24 }
  0x2b   :  { %320 = vmatpush1.bf16.msra.mxu1 %v694_v26 }
  0x2c   :  { %613 = vmatpush3.bf16.msra.mxu0 %v695_v29  ;;  %335 = vmatprep.subr.bf16.mxu1 %v734_v0 }
  0x2d   :  { %634 = vmatprep.subr.bf16.mxu0 %v735_v38 }
  0x2f   :  { %297 = vmatmul.mubr.bf16.vlgmr.msra.gmra.mxu0 %v49_v36  ;;  %336 = vmatpush2.bf16.msra.mxu1 %v696_v33 }
  0x30   :  { %635 = vmatpush3.bf16.msra.mxu0 %v697_v37  ;;  %654 = vmatprep.subr.bf16.mxu1 %v735_v38 }
  0x31   :  { %636 = vmatprep.subr.bf16.mxu0 %v735_v38  ;;  %650 = vmatprep.mubr.msk.bf16.mxu0 %vm736_vm1, %v735_v38 }
  0x32   :  { %338 = vmatmul.mubr.bf16.vlgmr.msra.gmra.mxu1 %v51_v39 }
  0x33   :  { %662 = vmatprep.mubr.msk.bf16.mxu1 %vm736_vm1, %v735_v38  ;;  %655 = vmatpush3.bf16.msra.mxu1 %v705_v47 }
  0x34   :  { %637 = vmatpush3.bf16.msra.mxu0 %v698_v40  ;;  %656 = vmatprep.subr.bf16.mxu1 %v735_v38 }
  0x35   :  { %638 = vmatprep.subr.bf16.mxu0 %v735_v38 }
  0x37   :  { %657 = vmatpush3.bf16.msra.mxu1 %v706_v2 }
  0x38   :  { %639 = vmatpush3.bf16.msra.mxu0 %v699_v41  ;;  %658 = vmatprep.subr.bf16.mxu1 %v735_v38 }
  0x39   :  { %640 = vmatprep.subr.bf16.mxu0 %v735_v38 }
  0x3b   :  { %659 = vmatpush3.bf16.msra.mxu1 %v707_v3 }
  0x3c   :  { %641 = vmatpush3.bf16.msra.mxu0 %v700_v42  ;;  %660 = vmatprep.subr.bf16.mxu1 %v735_v38 }
  0x3d   :  { %642 = vmatprep.subr.bf16.mxu0 %v735_v38 }
  0x3f   :  { %661 = vmatpush3.bf16.msra.mxu1 %v708_v4 }
  0x40   :  { %643 = vmatpush3.bf16.msra.mxu0 %v701_v43 }
  0x41   :  { %644 = vmatprep.subr.bf16.mxu0 %v735_v38 }
  0x44   :  { %645 = vmatpush3.bf16.msra.mxu0 %v702_v44 }
  0x45   :  { %646 = vmatprep.subr.bf16.mxu0 %v735_v38 }
  0x48   :  { %647 = vmatpush3.bf16.msra.mxu0 %v703_v45 }
  0x49   :  { %648 = vmatprep.subr.bf16.mxu0 %v735_v38 }
  0x4c   :  { %649 = vmatpush3.bf16.msra.mxu0 %v704_v46 }
  0xef   :  { %v614_v48 = vpop.f32.mrf.mxu0 }
  0xf1   :  { %v615_v49 = vpop.f32.mrf.mxu0 }
  0xf2   :  { %v616_v51 = vadd.f32 %v615_v49, %v614_v48  ;;  %v339_v52 = vpop.f32.mrf.mxu1 }
  0xf3   :  { %v617_v53 = vpop.f32.mrf.mxu0 }
  0xf4   :  { %v299_v54 = vadd.f32 %v616_v51, %v556_v50  ;;  %v341_v55 = vpop.f32.mrf.mxu1 }
  0xf5   :  { %v618_v56 = vpop.f32.mrf.mxu0 }
  0xf6   :  { %v619_v57 = vadd.f32 %v618_v56, %v617_v53  ;;  %v342_v58 = vpop.f32.mrf.mxu1  ;;  %v340_v59 = vadd.f32 %v339_v52, %v299_v54 }
  0xf8   :  { %v302_v60 = vadd.f32 %v619_v57, %v556_v50  ;;  %v344_v61 = vpop.f32.mrf.mxu1  ;;  %v346_v63 = vmax.f32 %v340_v59, 0.0 }
  0xfa   :  { %v343_v62 = vadd.f32 %v342_v58, %v302_v60 }
  0xfc   :  { %v347_v0 = vmax.f32 %v343_v62, 0.0 }
  0xfe   :  { %v348_v1 = vpack.c.bf16 %v347_v0, %v346_v63 }
 0x100   :  { %651 = vmatmul.mubr.bf16.vlgmr.msra.gmra.mxu0 %v348_v1 }
 0x1c0   :  { %v454_v6 = vpop.f32.mrf.mxu0 }
 0x1c1   :  { %v455_v8 = vadd.f32 %v583_v5, %v454_v6 }
 0x1c2   :  { %v652_v7 = vpop.f32.mrf.mxu0 }
 0x1c3   :  { %v461_v12 = vmax.f32 %v455_v8, 0.0 }
 0x1c4   :  { %v457_v9 = vpop.f32.mrf.mxu0 }
 0x1c5   :  { %v458_v10 = vadd.f32 %v583_v5, %v457_v9 }
 0x1c6   :  { %v653_v11 = vpop.f32.mrf.mxu0 }
 0x1c7   :  { %v462_v13 = vmax.f32 %v458_v10, 0.0 }
 0x1c9   :  { %v463_v14 = vpack.c.bf16 %v462_v13, %v461_v12 }
 0x1cb   :  { %663 = vmatmul.mubr.msk.bf16.vlgmr.msra.gmra.mxu1 %vm503_vm2, %v463_v14 }
 0x28b   :  { %v541_v16 = vpop.f32.mrf.mxu1 }
 0x28c   :  { %v542_v17 = vadd.f32 %v592_v15, %v541_v16 }
 0x28d   :  { %v664_v18 = vpop.f32.mrf.mxu1 }
 0x28e   :  { %549 = vst.msk [vmem:[%s871_s7] sm:$0xff] %vm548_vm3, %v542_v17 }
 0x28f   :  { %v544_v19 = vpop.f32.mrf.mxu1 }
 0x290   :  { %v545_v20 = vadd.f32 %v592_v15, %v544_v19 }
 0x291   :  { %v665_v21 = vpop.f32.mrf.mxu1 }
 0x292   :  { %550 = vst.msk [vmem:[%s871_s7 + $0x8] sm:$0xff] %vm548_vm3, %v545_v20 }
 0x293   :  { %555 = vsyncpa [#allocation3], 1 }

</bundles_post_ra>
